<compile_context>
chip_gen: v7x
topology: tpu7x:2x2x1
jax: 0.10.0
libtpu: 0.0.40
codegen_flags: <defaults>
</compile_context>

<pallas_src>
import functools

import jax
import jax.numpy as jnp
from jax.experimental import pallas as pl
from jax.experimental.pallas import tpu as pltpu


# ----------------------------------------------------------------------------
# Fused kernel: conv stack + token-length MLP + interpolation + reduction.
# ----------------------------------------------------------------------------
def _aligner_kernel(*refs, num_layers, kernel_size, dilation, pad0, pad_l,
                    inv_temp_sq):
    # refs: x, (w0,b0)...(wL-1,bL-1), w1t, b1, w2row, b2, out, zpad_scratch
    x_ref = refs[0]
    conv_refs = refs[1:1 + 2 * num_layers]
    w1t_ref, b1_ref, w2r_ref, b2_ref = refs[1 + 2 * num_layers:5 + 2 * num_layers]
    o_ref = refs[5 + 2 * num_layers]
    zpad_ref = refs[6 + 2 * num_layers]

    # Zero the halo scratch once; halo rows are never written afterwards, so
    # every shifted tap read below sees zero-padded "same" boundaries.
    zpad_ref[...] = jnp.zeros_like(zpad_ref)

    h = x_ref[0].astype(jnp.float32)                    # (T, Cin0), C on lanes
    T = h.shape[0]

    # ---------------- dilated Conv1d + ReLU stack (statically unrolled) -----
    for l in range(num_layers):
        w_ref = conv_refs[2 * l]                        # (Cin, K*Cout)
        b_ref = conv_refs[2 * l + 1]                    # (1, Cout)
        cout = b_ref.shape[1]

        # One MXU matmul per layer (weight-side im2col):
        #   z[t, k*Cout+co] = sum_ci h[t, ci] * w[co, ci, k]
        z = jnp.dot(h, w_ref[...], preferred_element_type=jnp.float32)

        # Body rows at an 8-aligned sublane offset; halo rows stay zero.
        zpad_ref[pad0:pad0 + T, :] = z

        # K shifted slice-adds == dilated taps with "same" padding.
        acc = jnp.zeros((T, cout), jnp.float32)
        for k in range(kernel_size):
            r0 = pad0 - pad_l + k * dilation            # static sublane offset
            win = zpad_ref[r0:r0 + T, :]                # (T, K*Cout), zero halo
            acc = acc + win[:, k * cout:(k + 1) * cout]

        h = jnp.maximum(acc + b_ref[...], 0.0)          # bias + ReLU, (T, Cout)

    hidden = h                                          # (T, C)

    # ---------------- MLP token lengths (softplus) ---------------------------
    z1 = jnp.maximum(
        jnp.dot(hidden, w1t_ref[...], preferred_element_type=jnp.float32)
        + b1_ref[...], 0.0)                             # (T, H)
    pre = jnp.sum(z1 * w2r_ref[...], axis=1, keepdims=True) + b2_ref[...]  # (T,1)
    # numerically stable softplus using only exp/log
    lengths_col = jnp.maximum(pre, 0.0) + jnp.log(1.0 + jnp.exp(-jnp.abs(pre)))

    # ---------------- centers = cumsum(lengths) - 0.5*lengths ---------------
    row = jax.lax.broadcasted_iota(jnp.int32, (T, T), 0)
    col = jax.lax.broadcasted_iota(jnp.int32, (T, T), 1)
    eye = (row == col).astype(jnp.float32)
    lower = (col <= row).astype(jnp.float32)            # inclusive cumsum mask
    lengths_row = jnp.sum(eye * lengths_col, axis=0, keepdims=True)   # (1, T)
    csum_col = jnp.sum(lower * lengths_row, axis=1, keepdims=True)    # (T, 1)
    centers_col = csum_col - 0.5 * lengths_col                        # (T, 1)

    # ---------------- interpolation weights (transposed orientation) --------
    # wtsT[u, t] = softmax_u( -temp^-2 * (centers[u] - lengths[t])^2 )
    diffT = centers_col - lengths_row                   # (T_u, T_t)
    aT = -inv_temp_sq * diffT * diffT
    mT = jnp.max(aT, axis=0, keepdims=True)
    eT = jnp.exp(aT - mT)
    wtsT = eT / jnp.sum(eT, axis=0, keepdims=True)      # (T_u, T_t)

    # ---------------- audio-aligned representation --------------------------
    # al[c, u] = sum_t hidden[t, c] * wts[t, u]  ->  alT = wtsT @ hidden
    alT = jnp.dot(wtsT, hidden, preferred_element_type=jnp.float32)   # (T_u, C)
    o_ref[0] = jnp.sum(alT, axis=0, keepdims=True)      # (1, C), lane-dense C


def _aligner_pallas(emb, conv_wb, mlp, kernel_size, dilation, temperature):
    """emb: (B, T, E) f32; conv_wb: [(w_big (Cin,K*Cout), b (1,Cout)), ...]."""
    B, T, E = emb.shape
    num_layers = len(conv_wb)
    cout = conv_wb[-1][1].shape[1]
    total = (kernel_size - 1) * dilation
    pad_l = total // 2
    pad_r = total - pad_l
    pad0 = ((pad_l + 7) // 8) * 8                       # 8-aligned left halo
    w1t, b1_row, w2_row, b2_11 = mlp

    kern = functools.partial(
        _aligner_kernel, num_layers=num_layers, kernel_size=kernel_size,
        dilation=dilation, pad0=pad0, pad_l=pad_l,
        inv_temp_sq=float(temperature) ** -2)

    in_specs = [pl.BlockSpec((1, T, E), lambda i: (i, 0, 0))]
    flat_in = [emb]
    for (w_big, b_row) in conv_wb:
        in_specs.append(pl.BlockSpec(w_big.shape, lambda i: (0, 0)))
        in_specs.append(pl.BlockSpec(b_row.shape, lambda i: (0, 0)))
        flat_in += [w_big, b_row]
    for arr in (w1t, b1_row, w2_row, b2_11):
        in_specs.append(pl.BlockSpec(arr.shape, lambda i: (0, 0)))
        flat_in.append(arr)

    out = pl.pallas_call(
        kern,
        out_shape=jax.ShapeDtypeStruct((B, 1, cout), jnp.float32),
        grid=(B,),
        in_specs=in_specs,
        out_specs=pl.BlockSpec((1, 1, cout), lambda i: (i, 0, 0)),
        scratch_shapes=[
            pltpu.VMEM((pad0 + T + pad_r, kernel_size * cout), jnp.float32)],
        compiler_params=pltpu.CompilerParams(
            dimension_semantics=("parallel",)),         # shard batches over TCs
    )(*flat_in)
    return out[:, 0, :]                                 # (B, C)


# ----------------------------------------------------------------------------
# Parameters + forward (embedding gather is XLA glue; everything else fused).
# ----------------------------------------------------------------------------
def init_params(key, n_vocab, embed_dims, num_layers, in_channel, out_channels,
                kernel_size, mlp_hidden):
    keys = jax.random.split(key, 1 + 2 * num_layers + 4)
    params = {"embedding": jax.random.normal(keys[0], (n_vocab, embed_dims),
                                             jnp.float32)}
    conv, cin = [], in_channel
    for l in range(num_layers):
        w = 0.3 * jax.random.normal(keys[1 + 2 * l],
                                    (out_channels, cin, kernel_size), jnp.float32)
        b = 0.1 * jax.random.normal(keys[2 + 2 * l], (out_channels,), jnp.float32)
        conv.append((w, b))
        cin = out_channels
    params["conv"] = conv
    params["w1"] = 0.3 * jax.random.normal(keys[-4], (mlp_hidden, out_channels), jnp.float32)
    params["b1"] = 0.1 * jax.random.normal(keys[-3], (mlp_hidden,), jnp.float32)
    params["w2"] = 0.3 * jax.random.normal(keys[-2], (1, mlp_hidden), jnp.float32)
    params["b2"] = 0.1 * jax.random.normal(keys[-1], (1,), jnp.float32)
    return params


def aligner_forward(params, inputs, dilation_rate, temperature=10.0):
    emb = params["embedding"][inputs]                   # (B, T, E) gather (glue)
    conv_wb = []
    K = params["conv"][0][0].shape[-1]
    for (w, b) in params["conv"]:
        cout, cin, k = w.shape
        # (Cout, Cin, K) -> (Cin, K*Cout): W_big[ci, k*Cout+co] = w[co, ci, k]
        w_big = jnp.transpose(w, (1, 2, 0)).reshape(cin, k * cout)
        conv_wb.append((w_big, b.reshape(1, cout)))
    mlp = (params["w1"].T,                              # (C, H)
           params["b1"].reshape(1, -1),                 # (1, H)
           params["w2"].reshape(1, -1),                 # (1, H)
           params["b2"].reshape(1, 1))                  # (1, 1)
    return _aligner_pallas(emb, conv_wb, mlp, K, dilation_rate, temperature)


# ----------------------------------------------------------------------------
# Pure-JAX reference: conv stack, MLP token lengths, centers, softmax
# interpolation weights, matmul + sum.  Used for validation.
# ----------------------------------------------------------------------------
def reference_forward(params, inputs, dilation_rate, temperature=10.0):
    hi = jax.lax.Precision.HIGHEST
    emb = params["embedding"][inputs]
    x = jnp.transpose(emb, (0, 2, 1))                   # (B, C, T) NCL
    for (w, b) in params["conv"]:
        K = w.shape[-1]
        total = (K - 1) * dilation_rate
        y = jax.lax.conv_general_dilated(
            x, w, window_strides=(1,),
            padding=[(total // 2, total - total // 2)],
            rhs_dilation=(dilation_rate,),
            dimension_numbers=("NCH", "OIH", "NCH"), precision=hi)
        x = jnp.maximum(y + b[None, :, None], 0.0)
    hidden = x                                          # (B, C, T)
    z = jnp.maximum(jnp.einsum("hc,bct->bht", params["w1"], hidden, precision=hi)
                    + params["b1"][None, :, None], 0.0)
    pre = jnp.einsum("oh,bht->bot", params["w2"], z, precision=hi) \
        + params["b2"][None, :, None]                   # (B, 1, T)
    lengths = jax.nn.softplus(pre)[:, 0, :]             # (B, T)
    centers = jnp.cumsum(lengths, axis=-1) - 0.5 * lengths
    diff = centers[:, None, :] - lengths[..., None]     # (B, T, T)
    alings = (-(temperature ** -2)) * diff * diff
    weights = jax.nn.softmax(alings, axis=-1)
    al = jnp.einsum("bct,btu->bcu", hidden, weights, precision=hi)
    return jnp.sum(al, axis=-1)                         # (B, C)


if __name__ == "__main__":
    n_vocab, embed_dims = 32, 8
    num_layers, in_channel, out_channels = 2, 8, 8
    kernel_size, dilation_rate = 3, 2
    mlp_hidden = 16
    B, T = 2, 8

    key = jax.random.PRNGKey(0)
    k_tok, k_par = jax.random.split(key)
    inputs = jax.random.randint(k_tok, (B, T), 0, n_vocab, dtype=jnp.int32)
    params = init_params(k_par, n_vocab, embed_dims, num_layers, in_channel,
                         out_channels, kernel_size, mlp_hidden)

    out = jax.block_until_ready(aligner_forward(params, inputs, dilation_rate))
    assert out.shape == (B, out_channels)

    ref = jax.block_until_ready(reference_forward(params, inputs, dilation_rate))
    if not bool(jnp.allclose(out, ref, rtol=2e-2, atol=2e-3)):
        raise AssertionError(f"Pallas vs reference mismatch:\n{out}\n{ref}")

    print("KERNEL_OK")
</pallas_src>

<mosaic_0001>
module attributes {stable_mosaic.version = 11 : i64} {
  func.func @_aligner_kernel(%arg0: i32, %arg1: memref<1x8x8xf32, #tpu.memory_space<vmem>>, %arg2: memref<8x24xf32, #tpu.memory_space<vmem>>, %arg3: memref<1x8xf32, #tpu.memory_space<vmem>>, %arg4: memref<8x24xf32, #tpu.memory_space<vmem>>, %arg5: memref<1x8xf32, #tpu.memory_space<vmem>>, %arg6: memref<8x16xf32, #tpu.memory_space<vmem>>, %arg7: memref<1x16xf32, #tpu.memory_space<vmem>>, %arg8: memref<1x16xf32, #tpu.memory_space<vmem>>, %arg9: memref<1x1xf32, #tpu.memory_space<vmem>>, %arg10: memref<1x1x8xf32, #tpu.memory_space<vmem>>, %arg11: memref<18x24xf32, #tpu.memory_space<vmem>>) attributes {dimension_semantics = [#tpu.dimension_semantics<parallel>], iteration_bounds = array<i64: 2>, scalar_prefetch = 0 : i64, scratch_operands = 1 : i64, tpu.core_type = #tpu.core_type<tc>, window_params = [{transform_indices = @transform_0, window_bounds = array<i64: 1, 8, 8>}, {pipeline_mode = #tpu.pipeline_mode<synchronous>, transform_indices = @transform_1, window_bounds = array<i64: 8, 24>}, {pipeline_mode = #tpu.pipeline_mode<synchronous>, transform_indices = @transform_2, window_bounds = array<i64: 1, 8>}, {pipeline_mode = #tpu.pipeline_mode<synchronous>, transform_indices = @transform_3, window_bounds = array<i64: 8, 24>}, {pipeline_mode = #tpu.pipeline_mode<synchronous>, transform_indices = @transform_4, window_bounds = array<i64: 1, 8>}, {pipeline_mode = #tpu.pipeline_mode<synchronous>, transform_indices = @transform_5, window_bounds = array<i64: 8, 16>}, {pipeline_mode = #tpu.pipeline_mode<synchronous>, transform_indices = @transform_6, window_bounds = array<i64: 1, 16>}, {pipeline_mode = #tpu.pipeline_mode<synchronous>, transform_indices = @transform_7, window_bounds = array<i64: 1, 16>}, {pipeline_mode = #tpu.pipeline_mode<synchronous>, transform_indices = @transform_8, window_bounds = array<i64: 1, 1>}, {transform_indices = @transform_9, window_bounds = array<i64: 1, 1, 8>}]} {
    %cst = arith.constant 0.000000e+00 : f32
    %0 = vector.broadcast %cst : f32 to vector<18x24xf32>
    %c0 = arith.constant 0 : index
    %c0_0 = arith.constant 0 : index
    %1 = vector.load %arg11[%c0, %c0_0] : memref<18x24xf32, #tpu.memory_space<vmem>>, vector<18x24xf32>
    tpu.vector_store %arg11[%c0, %c0_0], %0 {strides = array<i32>} : memref<18x24xf32, #tpu.memory_space<vmem>>, vector<18x24xf32>,
    %c0_1 = arith.constant 0 : index
    %c0_2 = arith.constant 0 : index
    %c0_3 = arith.constant 0 : index
    %2 = vector.load %arg1[%c0_1, %c0_2, %c0_3] : memref<1x8x8xf32, #tpu.memory_space<vmem>>, vector<1x8x8xf32>
    %3 = vector.shape_cast %2 : vector<1x8x8xf32> to vector<8x8xf32>
    %c0_4 = arith.constant 0 : index
    %c0_5 = arith.constant 0 : index
    %4 = vector.load %arg2[%c0_4, %c0_5] : memref<8x24xf32, #tpu.memory_space<vmem>>, vector<8x24xf32>
    %cst_6 = arith.constant dense<0.000000e+00> : vector<8x24xf32>
    %5 = tpu.matmul %3, %4, %cst_6 {dimension_numbers = #tpu.dot_dimension_numbers<[1], [0], [0], [1], [0, 0, 1, 1], [], []>} : vector<8x8xf32>, vector<8x24xf32>, vector<8x24xf32> -> vector<8x24xf32>
    %c8 = arith.constant 8 : index
    %c0_7 = arith.constant 0 : index
    %6 = vector.load %arg11[%c8, %c0_7] : memref<18x24xf32, #tpu.memory_space<vmem>>, vector<8x24xf32>
    tpu.vector_store %arg11[%c8, %c0_7], %5 {strides = array<i32>} : memref<18x24xf32, #tpu.memory_space<vmem>>, vector<8x24xf32>,
    %cst_8 = arith.constant 0.000000e+00 : f32
    %7 = vector.broadcast %cst_8 : f32 to vector<8x8xf32>
    %c6 = arith.constant 6 : index
    %c0_9 = arith.constant 0 : index
    %8 = vector.load %arg11[%c6, %c0_9] : memref<18x24xf32, #tpu.memory_space<vmem>>, vector<8x24xf32>
    %9 = vector.extract_strided_slice %8 {offsets = [0, 0], sizes = [8, 8], strides = [1, 1]} : vector<8x24xf32> to vector<8x8xf32>
    %10 = arith.addf %7, %9 : vector<8x8xf32>
    %c8_10 = arith.constant 8 : index
    %c0_11 = arith.constant 0 : index
    %11 = vector.load %arg11[%c8_10, %c0_11] : memref<18x24xf32, #tpu.memory_space<vmem>>, vector<8x24xf32>
    %12 = vector.extract_strided_slice %11 {offsets = [0, 8], sizes = [8, 8], strides = [1, 1]} : vector<8x24xf32> to vector<8x8xf32>
    %13 = arith.addf %10, %12 : vector<8x8xf32>
    %c10 = arith.constant 10 : index
    %c0_12 = arith.constant 0 : index
    %14 = vector.load %arg11[%c10, %c0_12] : memref<18x24xf32, #tpu.memory_space<vmem>>, vector<8x24xf32>
    %15 = vector.extract_strided_slice %14 {offsets = [0, 16], sizes = [8, 8], strides = [1, 1]} : vector<8x24xf32> to vector<8x8xf32>
    %16 = arith.addf %13, %15 : vector<8x8xf32>
    %c0_13 = arith.constant 0 : index
    %c0_14 = arith.constant 0 : index
    %17 = vector.load %arg3[%c0_13, %c0_14] : memref<1x8xf32, #tpu.memory_space<vmem>>, vector<1x8xf32>
    %18 = vector.broadcast %17 : vector<1x8xf32> to vector<8x8xf32>
    %19 = arith.addf %16, %18 : vector<8x8xf32>
    %cst_15 = arith.constant 0.000000e+00 : f32
    %20 = vector.broadcast %cst_15 : f32 to vector<8x8xf32>
    %21 = arith.maximumf %19, %20 : vector<8x8xf32>
    %c0_16 = arith.constant 0 : index
    %c0_17 = arith.constant 0 : index
    %22 = vector.load %arg4[%c0_16, %c0_17] : memref<8x24xf32, #tpu.memory_space<vmem>>, vector<8x24xf32>
    %cst_18 = arith.constant dense<0.000000e+00> : vector<8x24xf32>
    %23 = tpu.matmul %21, %22, %cst_18 {dimension_numbers = #tpu.dot_dimension_numbers<[1], [0], [0], [1], [0, 0, 1, 1], [], []>} : vector<8x8xf32>, vector<8x24xf32>, vector<8x24xf32> -> vector<8x24xf32>
    %c8_19 = arith.constant 8 : index
    %c0_20 = arith.constant 0 : index
    %24 = vector.load %arg11[%c8_19, %c0_20] : memref<18x24xf32, #tpu.memory_space<vmem>>, vector<8x24xf32>
    tpu.vector_store %arg11[%c8_19, %c0_20], %23 {strides = array<i32>} : memref<18x24xf32, #tpu.memory_space<vmem>>, vector<8x24xf32>,
    %cst_21 = arith.constant 0.000000e+00 : f32
    %25 = vector.broadcast %cst_21 : f32 to vector<8x8xf32>
    %c6_22 = arith.constant 6 : index
    %c0_23 = arith.constant 0 : index
    %26 = vector.load %arg11[%c6_22, %c0_23] : memref<18x24xf32, #tpu.memory_space<vmem>>, vector<8x24xf32>
    %27 = vector.extract_strided_slice %26 {offsets = [0, 0], sizes = [8, 8], strides = [1, 1]} : vector<8x24xf32> to vector<8x8xf32>
    %28 = arith.addf %25, %27 : vector<8x8xf32>
    %c8_24 = arith.constant 8 : index
    %c0_25 = arith.constant 0 : index
    %29 = vector.load %arg11[%c8_24, %c0_25] : memref<18x24xf32, #tpu.memory_space<vmem>>, vector<8x24xf32>
    %30 = vector.extract_strided_slice %29 {offsets = [0, 8], sizes = [8, 8], strides = [1, 1]} : vector<8x24xf32> to vector<8x8xf32>
    %31 = arith.addf %28, %30 : vector<8x8xf32>
    %c10_26 = arith.constant 10 : index
    %c0_27 = arith.constant 0 : index
    %32 = vector.load %arg11[%c10_26, %c0_27] : memref<18x24xf32, #tpu.memory_space<vmem>>, vector<8x24xf32>
    %33 = vector.extract_strided_slice %32 {offsets = [0, 16], sizes = [8, 8], strides = [1, 1]} : vector<8x24xf32> to vector<8x8xf32>
    %34 = arith.addf %31, %33 : vector<8x8xf32>
    %c0_28 = arith.constant 0 : index
    %c0_29 = arith.constant 0 : index
    %35 = vector.load %arg5[%c0_28, %c0_29] : memref<1x8xf32, #tpu.memory_space<vmem>>, vector<1x8xf32>
    %36 = vector.broadcast %35 : vector<1x8xf32> to vector<8x8xf32>
    %37 = arith.addf %34, %36 : vector<8x8xf32>
    %cst_30 = arith.constant 0.000000e+00 : f32
    %38 = vector.broadcast %cst_30 : f32 to vector<8x8xf32>
    %39 = arith.maximumf %37, %38 : vector<8x8xf32>
    %c0_31 = arith.constant 0 : index
    %c0_32 = arith.constant 0 : index
    %40 = vector.load %arg6[%c0_31, %c0_32] : memref<8x16xf32, #tpu.memory_space<vmem>>, vector<8x16xf32>
    %cst_33 = arith.constant dense<0.000000e+00> : vector<8x16xf32>
    %41 = tpu.matmul %39, %40, %cst_33 {dimension_numbers = #tpu.dot_dimension_numbers<[1], [0], [0], [1], [0, 0, 1, 1], [], []>} : vector<8x8xf32>, vector<8x16xf32>, vector<8x16xf32> -> vector<8x16xf32>
    %c0_34 = arith.constant 0 : index
    %c0_35 = arith.constant 0 : index
    %42 = vector.load %arg7[%c0_34, %c0_35] : memref<1x16xf32, #tpu.memory_space<vmem>>, vector<1x16xf32>
    %43 = vector.broadcast %42 : vector<1x16xf32> to vector<8x16xf32>
    %44 = arith.addf %41, %43 : vector<8x16xf32>
    %cst_36 = arith.constant 0.000000e+00 : f32
    %45 = vector.broadcast %cst_36 : f32 to vector<8x16xf32>
    %46 = arith.maximumf %44, %45 : vector<8x16xf32>
    %c0_37 = arith.constant 0 : index
    %c0_38 = arith.constant 0 : index
    %47 = vector.load %arg8[%c0_37, %c0_38] : memref<1x16xf32, #tpu.memory_space<vmem>>, vector<1x16xf32>
    %48 = vector.broadcast %47 : vector<1x16xf32> to vector<8x16xf32>
    %49 = arith.mulf %46, %48 : vector<8x16xf32>
    %cst_39 = arith.constant dense<0.000000e+00> : vector<8xf32>
    %50 = vector.multi_reduction <add>, %49, %cst_39 [1] : vector<8x16xf32> to vector<8xf32>
    %51 = vector.shape_cast %50 : vector<8xf32> to vector<8x1xf32>
    %c0_40 = arith.constant 0 : index
    %c0_41 = arith.constant 0 : index
    %52 = vector.load %arg9[%c0_40, %c0_41] : memref<1x1xf32, #tpu.memory_space<vmem>>, vector<1x1xf32>
    %53 = vector.broadcast %52 : vector<1x1xf32> to vector<8x1xf32>
    %54 = arith.addf %51, %53 : vector<8x1xf32>
    %cst_42 = arith.constant 0.000000e+00 : f32
    %55 = vector.broadcast %cst_42 : f32 to vector<8x1xf32>
    %56 = arith.maximumf %54, %55 : vector<8x1xf32>
    %57 = math.absf %54 : vector<8x1xf32>
    %cst_43 = arith.constant 0.000000e+00 : f32
    %58 = vector.broadcast %cst_43 : f32 to vector<8x1xf32>
    %59 = arith.subf %58, %57 : vector<8x1xf32>
    %60 = math.exp %59 : vector<8x1xf32>
    %cst_44 = arith.constant 1.000000e+00 : f32
    %61 = vector.broadcast %cst_44 : f32 to vector<8x1xf32>
    %62 = arith.addf %61, %60 : vector<8x1xf32>
    %63 = math.log %62 : vector<8x1xf32>
    %64 = arith.addf %56, %63 : vector<8x1xf32>
    %65 = tpu.iota {dimensions = array<i32: 0>} : vector<8x8xi32>
    %66 = tpu.iota {dimensions = array<i32: 1>} : vector<8x8xi32>
    %67 = arith.cmpi eq, %65, %66 : vector<8x8xi32>
    %68 = arith.extui %67 : vector<8x8xi1> to vector<8x8xi32>
    %69 = arith.sitofp %68 : vector<8x8xi32> to vector<8x8xf32>
    %70 = arith.cmpi sle, %66, %65 : vector<8x8xi32>
    %71 = arith.extui %70 : vector<8x8xi1> to vector<8x8xi32>
    %72 = arith.sitofp %71 : vector<8x8xi32> to vector<8x8xf32>
    %73 = vector.broadcast %64 : vector<8x1xf32> to vector<8x8xf32>
    %74 = arith.mulf %69, %73 : vector<8x8xf32>
    %cst_45 = arith.constant dense<0.000000e+00> : vector<8xf32>
    %75 = vector.multi_reduction <add>, %74, %cst_45 [0] : vector<8x8xf32> to vector<8xf32>
    %76 = vector.shape_cast %75 : vector<8xf32> to vector<1x8xf32>
    %77 = vector.broadcast %76 : vector<1x8xf32> to vector<8x8xf32>
    %78 = arith.mulf %72, %77 : vector<8x8xf32>
    %cst_46 = arith.constant dense<0.000000e+00> : vector<8xf32>
    %79 = vector.multi_reduction <add>, %78, %cst_46 [1] : vector<8x8xf32> to vector<8xf32>
    %80 = vector.shape_cast %79 : vector<8xf32> to vector<8x1xf32>
    %cst_47 = arith.constant 5.000000e-01 : f32
    %81 = vector.broadcast %cst_47 : f32 to vector<8x1xf32>
    %82 = arith.mulf %81, %64 : vector<8x1xf32>
    %83 = arith.subf %80, %82 : vector<8x1xf32>
    %84 = vector.broadcast %83 : vector<8x1xf32> to vector<8x8xf32>
    %85 = vector.broadcast %76 : vector<1x8xf32> to vector<8x8xf32>
    %86 = arith.subf %84, %85 : vector<8x8xf32>
    %cst_48 = arith.constant -0.00999999977 : f32
    %87 = vector.broadcast %cst_48 : f32 to vector<8x8xf32>
    %88 = arith.mulf %87, %86 : vector<8x8xf32>
    %89 = arith.mulf %88, %86 : vector<8x8xf32>
    %cst_49 = arith.constant dense<0xFF800000> : vector<8xf32>
    %90 = vector.multi_reduction <maximumf>, %89, %cst_49 [0] : vector<8x8xf32> to vector<8xf32>
    %91 = vector.shape_cast %90 : vector<8xf32> to vector<1x8xf32>
    %92 = vector.broadcast %91 : vector<1x8xf32> to vector<8x8xf32>
    %93 = arith.subf %89, %92 : vector<8x8xf32>
    %94 = math.exp %93 : vector<8x8xf32>
    %cst_50 = arith.constant dense<0.000000e+00> : vector<8xf32>
    %95 = vector.multi_reduction <add>, %94, %cst_50 [0] : vector<8x8xf32> to vector<8xf32>
    %96 = vector.shape_cast %95 : vector<8xf32> to vector<1x8xf32>
    %97 = vector.broadcast %96 : vector<1x8xf32> to vector<8x8xf32>
    %98 = arith.divf %94, %97 : vector<8x8xf32>
    %cst_51 = arith.constant dense<0.000000e+00> : vector<8x8xf32>
    %99 = tpu.matmul %98, %39, %cst_51 {dimension_numbers = #tpu.dot_dimension_numbers<[1], [0], [0], [1], [0, 0, 1, 1], [], []>} : vector<8x8xf32>, vector<8x8xf32>, vector<8x8xf32> -> vector<8x8xf32>
    %cst_52 = arith.constant dense<0.000000e+00> : vector<8xf32>
    %100 = vector.multi_reduction <add>, %99, %cst_52 [0] : vector<8x8xf32> to vector<8xf32>
    %101 = vector.shape_cast %100 : vector<8xf32> to vector<1x8xf32>
    %c0_53 = arith.constant 0 : index
    %c0_54 = arith.constant 0 : index
    %c0_55 = arith.constant 0 : index
    %102 = vector.load %arg10[%c0_53, %c0_54, %c0_55] : memref<1x1x8xf32, #tpu.memory_space<vmem>>, vector<1x1x8xf32>
    %103 = vector.shape_cast %102 : vector<1x1x8xf32> to vector<1x8xf32>
    %104 = vector.shape_cast %101 : vector<1x8xf32> to vector<1x1x8xf32>
    tpu.vector_store %arg10[%c0_53, %c0_54, %c0_55], %104 {strides = array<i32>} : memref<1x1x8xf32, #tpu.memory_space<vmem>>, vector<1x1x8xf32>,
    return
  }
  func.func @transform_0(%arg0: i32) -> (i32, i32, i32) {
    %c0_i32 = arith.constant 0 : i32
    %c0_i32_0 = arith.constant 0 : i32
    %c0_i32_1 = arith.constant 0 : i32
    return %arg0, %c0_i32, %c0_i32_0 : i32, i32, i32
  }
  func.func @transform_1(%arg0: i32) -> (i32, i32) {
    %c0_i32 = arith.constant 0 : i32
    %c0_i32_0 = arith.constant 0 : i32
    %c0_i32_1 = arith.constant 0 : i32
    return %c0_i32, %c0_i32_0 : i32, i32
  }
  func.func @transform_2(%arg0: i32) -> (i32, i32) {
    %c0_i32 = arith.constant 0 : i32
    %c0_i32_0 = arith.constant 0 : i32
    %c0_i32_1 = arith.constant 0 : i32
    return %c0_i32, %c0_i32_0 : i32, i32
  }
  func.func @transform_3(%arg0: i32) -> (i32, i32) {
    %c0_i32 = arith.constant 0 : i32
    %c0_i32_0 = arith.constant 0 : i32
    %c0_i32_1 = arith.constant 0 : i32
    return %c0_i32, %c0_i32_0 : i32, i32
  }
  func.func @transform_4(%arg0: i32) -> (i32, i32) {
    %c0_i32 = arith.constant 0 : i32
    %c0_i32_0 = arith.constant 0 : i32
    %c0_i32_1 = arith.constant 0 : i32
    return %c0_i32, %c0_i32_0 : i32, i32
  }
  func.func @transform_5(%arg0: i32) -> (i32, i32) {
    %c0_i32 = arith.constant 0 : i32
    %c0_i32_0 = arith.constant 0 : i32
    %c0_i32_1 = arith.constant 0 : i32
    return %c0_i32, %c0_i32_0 : i32, i32
  }
  func.func @transform_6(%arg0: i32) -> (i32, i32) {
    %c0_i32 = arith.constant 0 : i32
    %c0_i32_0 = arith.constant 0 : i32
    %c0_i32_1 = arith.constant 0 : i32
    return %c0_i32, %c0_i32_0 : i32, i32
  }
  func.func @transform_7(%arg0: i32) -> (i32, i32) {
    %c0_i32 = arith.constant 0 : i32
    %c0_i32_0 = arith.constant 0 : i32
    %c0_i32_1 = arith.constant 0 : i32
    return %c0_i32, %c0_i32_0 : i32, i32
  }
  func.func @transform_8(%arg0: i32) -> (i32, i32) {
    %c0_i32 = arith.constant 0 : i32
    %c0_i32_0 = arith.constant 0 : i32
    %c0_i32_1 = arith.constant 0 : i32
    return %c0_i32, %c0_i32_0 : i32, i32
  }
  func.func @transform_9(%arg0: i32) -> (i32, i32, i32) {
    %c0_i32 = arith.constant 0 : i32
    %c0_i32_0 = arith.constant 0 : i32
    %c0_i32_1 = arith.constant 0 : i32
    return %arg0, %c0_i32, %c0_i32_0 : i32, i32, i32
  }
}

</mosaic_0001>

<bundles_post_ra>
// kernel: tpu_custom_call.1
= control target key start
LH: loop header
LB: loop body
LE: loop exit
PB: predicated region body
PF: predicated region fallthrough
CT: control target
= control target key end

     0   :  { %s1467_s0 = inlined_call_operand.hbm [shape: f32[2,8,8], index: 0, kind: input, shape index: {}]   ;;  %s1468_s1 = inlined_call_operand.hbm [shape: f32[8,24], index: 1, kind: input, shape index: {}]   ;;  %s1469_s2 = inlined_call_operand.vmem [shape: f32[1,8], index: 2, kind: input, shape index: {}]   ;;  %s1470_s3 = inlined_call_operand.vmem [shape: f32[8,24], index: 3, kind: input, shape index: {}]   ;;  %s1471_s4 = inlined_call_operand.vmem [shape: f32[1,8], index: 4, kind: input, shape index: {}]   ;;  %s1472_s5 = inlined_call_operand.vmem [shape: f32[8,16], index: 5, kind: input, shape index: {}]   ;;  %s1473_s6 = inlined_call_operand.vmem [shape: f32[1,16], index: 6, kind: input, shape index: {}]   ;;  %s1474_s7 = inlined_call_operand.vmem [shape: f32[1,16], index: 7, kind: input, shape index: {}]   ;;  %s1475_s8 = inlined_call_operand.<no memory space> [shape: f32[1,1], index: 8, kind: input, shape index: {}]   ;;  %s1476_s9 = inlined_call_operand.hbm [shape: f32[2,1,8], index: 9, kind: output, shape index: {}]  }
   0x1   :  { %v14_v0 = vstv %s1475_s8 }
   0x2   :  { %15 = vst [vmem:[#allocation3] sm:$0x1] %v14_v0 }
   0x3   :  { %16 = vsyncpa [#allocation5], 0 }
   0x4   :  { %18 = vsyncpa [#allocation5 + $0x1], 0 }
   0x5   :  { %19 = vsyncpa [#allocation8], 0 }
   0x6   :  { %20 = vsyncpa [#allocation6], 0 }
   0x7   :  { %22 = vsyncpa [#allocation6 + $0x1], 0  ;;  %s1217_s11 = smov 0   ;;  %s1219_s12 = smov 0  }
   0x8   :  { %s1221_s13 = smov 0   ;;  %s1223_s14 = smov 0  }
   0x9 LB: > { %s1238_s8 = sadd.s32 4294967295, %s1154_s14   ;;  %s903_s15 = sadd.s32 4294967294, %s1154_s14   ;;  %s1154_s14 = sphi %s1223_s14, %s1500_s14   ;;  %s1150_s13 = sphi %s1221_s13, %s1499_s13   ;;  %s1146_s12 = sphi %s1219_s12, %s1498_s12   ;;  %s1142_s11 = sphi %s1217_s11, %s1497_s11  }
   0xa   : > { %p48_p0 = scmp.ne.s32.totalorder %s1146_s12, %s1142_s11  ;;  %p1477_p1 = scmp.eq.s32.totalorder %s1238_s8, 0 }
   0xb   : > { %p246_p3 = scmp.eq.s32.totalorder %s903_s15, 1  ;;  %p904_p5 = scmp.ge.s32.totalorder %s1154_s14, 1 }
   0xc   : > { %p1247_p4 = por %p1477_p1, %p48_p0  ;;  %p253_p7 = scmp.lt.s32.totalorder %s1154_s14, 3 }
   0xd   : > { %p1252_p6 = por %p246_p3, %p48_p0  ;;  %s1156_s19 = smov [#allocation7]  }
   0xe   : > { %s1480_s16 = scalar_select %p1247_p4, 1, 0 }
   0xf   : > { %s1481_s17 = scalar_select %p1252_p6, 1, 0 }
  0x10   : > { %p1257_p8 = pnand %p904_p5, %p253_p7  ;;  %s266_s20 = sshll.u32 %s1156_s19, 4  ;;  %s267_s20 = int_to_ptr.vmem [resolvable:$true] %s266_s20 }
  0x11   : > { %s1265_s21 = sadd.s32 1, %s1154_s14   ;;  %s35_s25 = sadd.s32 1, %s1150_s13 }
  0x12   : > { %s1482_s18 = scalar_select %p1257_p8, 1, 0 }
  0x13   : > { %p962_p10 = pneg %p1257_p8  ;;  %s32_s23 = ssub.s32 %s1154_s14, %s1265_s21 }
  0x14   : > { %p1275_p12 = scmp.eq.s32.totalorder %s32_s23, 0  ;;  %s1026_s28 = scalar_lea.hbm %s1468_s1, 128 }
  0x15   : > { %p1269_p11 = pnand %p962_p10, %p1477_p1  ;;  %p1027_p0 = scmp.ne.s32.totalorder %s1468_s1, %s1026_s28 }
  0x16   : > { %s1484_s24 = scalar_select %p1275_p12, 1, 0 }
  0x17   : > { %p1028_p3 = pneg %p1269_p11  ;;  %p1033_p10 = scmp.lt.u32.totalorder %s1026_s28, %s1468_s1 }
  0x19   : > { %p1029_p5 = pnand %p1028_p3, %p1027_p0 }
  0x1b   : > { %p1030_p7 = pneg %p1029_p5 }
  0x1d   : > { %p1035_p9 = pnand %p1033_p10, %p1030_p7 }
  0x1f   : > { %1038 = shalt.err (!%p1035_p9)
}
  0x20   : > { %s1039_s19 = scalar_lea.vmem %s267_s20, 128  ;;  %p1047_p6 = scmp.lt.s32.totalorder %s267_s20, %s267_s20 }
  0x21   : > { %p1040_p1 = scmp.ne.s32.totalorder %s267_s20, %s1039_s19  ;;  %p1048_p4 = scmp.lt.s32.totalorder %s1039_s19, %s1039_s19 }
  0x23   : > { %p1042_p2 = pnand %p1040_p1, %p1028_p3  ;;  %p1049_p8 = por %p1048_p4, %p1047_p6 }
  0x25   : > { %p1043_p13 = pneg %p1042_p2 }
  0x27   : > { %p1050_p12 = pnand %p1049_p8, %p1043_p13 }
  0x29   : > { %1053 = shalt.err (!%p1050_p12)
}
  0x2a   : > { %965 = dma.hbm_to_vmem [thread:$0]  (!%p1269_p11), %s1468_s1, 128, %s267_s20, [#allocation8]  }
  0x2b   : > { %p1485_p1 = scmp.ne.s32.totalorder %s1484_s24, 0  ;;  %p43_p2 = scmp.eq.s32.totalorder %s1154_s14, 0 }
  0x2c   : > { %p1486_p4 = scmp.ne.s32.totalorder %s1150_s13, %s1146_s12  ;;  %p1487_p6 = scmp.eq.s32.totalorder %s1238_s8, 1 }
  0x2d   : > { %s1301_s27 = scalar_select %p1485_p1, %s1150_s13, %s35_s25  }
  0x2e   : > { %p1309_p8 = por %p1487_p6, %p1486_p4  ;;  %p975_p9 = scmp.lt.s32.totalorder %s1154_s14, 2 }
  0x2f   : > { %s298_s28 = sand.u32 1, %s1150_s13   ;;  %p1489_p12 = pmov %p1486_p4 }
  0x30   : > { %s907_s29 = sshll.u32 %s298_s28, 3  ;;  %s908_s30 = sshll.u32 %s1154_s14, 7 }
  0x31   : > { %p44_p13 = por %p43_p2, %p1489_p12  ;;  %s1322_s20 = scalar_lea.hbm %s1467_s0, %s908_s30 }
  0x32   : > { %s302_s24 = scalar_lea.vmem [#allocation4], %s907_s29  ;;  %s299_s23 = scalar_lea.sflag [#allocation5], %s298_s28 }
  0x33   : > { %s309_s25 = sshll.u32 %s302_s24, 4  ;;  %p1324_p11 = pnand %p975_p9, %p44_p13  ;;  %s1328_s25 = int_to_ptr.vmem [resolvable:$true] %s309_s25 }
  0x34   : > { %s1054_s26 = scalar_lea.hbm %s1322_s20, 128  ;;  %s1059_s10 = scalar_lea.hbm %s1467_s0, 256 }
  0x35   : > { %p1055_p0 = scmp.ne.s32.totalorder %s1322_s20, %s1054_s26  ;;  %p1056_p3 = pneg %p1324_p11 }
  0x36   : > { %p1060_p10 = scmp.lt.u32.totalorder %s1322_s20, %s1467_s0  ;;  %p1061_p1 = scmp.lt.u32.totalorder %s1059_s10, %s1054_s26 }
  0x37   : > { %p1057_p5 = pnand %p1056_p3, %p1055_p0  ;;  %p1063_p4 = scmp.lt.u32.totalorder %s1054_s26, %s1322_s20 }
  0x38   : > { %p1062_p2 = por %p1061_p1, %p1060_p10 }
  0x39   : > { %p1058_p7 = pneg %p1057_p5 }
  0x3a   : > { %p1064_p6 = por %p1063_p4, %p1062_p2 }
  0x3c   : > { %p1065_p9 = pnand %p1064_p6, %p1058_p7 }
  0x3e   : > { %1068 = shalt.err (!%p1065_p9)
}
  0x3f   : > { %s1069_s28 = scalar_lea.vmem %s1328_s25, 128  ;;  %s1157_s30 = smov [#allocation4]  }
  0x40   : > { %p1070_p12 = scmp.ne.s32.totalorder %s1328_s25, %s1069_s28  ;;  %s1074_s29 = sshll.u32 %s1157_s30, 4  ;;  %s1075_s29 = int_to_ptr.vmem [resolvable:$false] %s1074_s29 }
  0x41   : > { %s1076_s15 = scalar_lea.vmem %s1075_s29, 256  ;;  %p1077_p5 = scmp.lt.s32.totalorder %s1328_s25, %s1075_s29 }
  0x42   : > { %p1072_p13 = pnand %p1070_p12, %p1056_p3  ;;  %p1078_p10 = scmp.lt.s32.totalorder %s1076_s15, %s1069_s28 }
  0x44   : > { %p1073_p0 = pneg %p1072_p13  ;;  %p1079_p1 = por %p1078_p10, %p1077_p5 }
  0x46   : > { %p1080_p2 = pnand %p1079_p1, %p1073_p0 }
  0x48   : > { %1083 = shalt.err (!%p1080_p2)
}
  0x49   : > { %969 = dma.hbm_to_vmem [thread:$0]  (!%p1324_p11), %s1322_s20, 128, %s1328_s25, %s299_s23  }
  0x4a   : > { %p1491_p7 = scmp.ne.s32.totalorder %s1482_s18, 0 }
  0x4b   : > { %s1358_s26 = sand.u32 (!%p1491_p7), 1, %s1146_s12   ;;  %p1492_p3 = scmp.ne.s32.totalorder (!%p1491_p7), %s1480_s16, 0 }
  0x4c   : > { %318 = sbr.rel (%p1491_p7) target bundleno = 1895 (0x767), region = 56  ;;  %s910_s10 = sshll.u32 (!%p1491_p7), %s1358_s26, 3 }
  0x4d   : > { %s321_s24 = scalar_lea.sflag (!%p1491_p7), [#allocation5], %s1358_s26  ;;  %s324_s28 = scalar_lea.vmem (!%p1491_p7), [#allocation4], %s910_s10 }
  0x53   : > { %1129 = dma.done.wait (%p1492_p3), %s321_s24, 128  }
  0x54   : > { %1131 = vsyncadd (%p1492_p3), %s321_s24, 4294967168  ;;  %p1493_p4 = scmp.eq.s32.totalorder %s1238_s8, 0 }
  0x56   : > { %1133 = dma.done.wait (%p1493_p4), [#allocation8], 128   ;;  %p1494_p11 = pmov %p1493_p4 }
  0x57   : > { %vm362_vm0 = vcmask 195584   ;;  %v1158_v1 = vmov 0.0   ;;  %vm1159_vm1 = vmmov 0   ;;  %vm369_vm2 = vcmask 64512   ;;  %v368_v2 = vld [vmem:[#allocation7] sm:$0xff]  ;;  %v367_v3 = vld [vmem:[%s324_s28] sm:$0xff] }
  0x58   : > { %1135 = vsyncadd (%p1494_p11), [#allocation8], 4294967168  ;;  %934 = vmatprep.subr.mxu0 %v1158_v1  ;;  %936 = vmatprep.mubr.msk.f32.mxu0 %vm1159_vm1, %v1158_v1  ;;  %363 = vst.msk [vmem:[#allocation2] sm:$0xff] %vm362_vm0, %v1158_v1  ;;  %vm365_vm3 = vcmask 189440   ;;  %v467_v6 = vld [vmem:[%s1470_s3] sm:$0xff]  ;;  %s1160_s20 = smov 120   ;;  %v676_v51 = vlaneseq }
  0x59   : > { %364 = vst.msk [vmem:[#allocation2 + $0x8] sm:$0xff] %vm362_vm0, %v1158_v1  ;;  %939 = vmatprep.subr.mxu1 %v1158_v1  ;;  %941 = vmatprep.mubr.msk.f32.mxu1 %vm1159_vm1, %v1158_v1  ;;  %s1161_s25 = smov 112   ;;  %v913_v12 = vld [vmem:[%s1469_s2] ss:$0 sm:$0xff]  ;;  %vm655_vm4 = vcmask 130048   ;;  %v1162_v38 = vmov 0  }
  0x5a   : > { %935 = vmatpush3.msra.mxu0 %v368_v2  ;;  %366 = vst.msk [vmem:[#allocation2 + $0x10] sm:$0x3] %vm365_vm3, %v1158_v1  ;;  %940 = vmatpush3.msra.mxu1 %v467_v6  ;;  %v565_v19 = vld [vmem:[%s1472_s5] sm:$0xff]  ;;  %v919_v39 = vld [vmem:[#allocation3] ss:$0 sm:$0xff]  ;;  %v677_v52 = vshrl.u32 %v676_v51, 7 }
  0x5b   : > { %937 = vmatmul.mubr.msk.f32.vlgmr.msra.gmra.mrb[0].mxu0 %vm369_vm2, %v367_v3  ;;  %944 = vmatprep.subr.mxu0 %v1158_v1  ;;  %v915_v25 = vld [vmem:[%s1471_s4] ss:$0 sm:$0xff]  ;;  %v679_v53 = vand.u32 127, %v676_v51  ;;  %vm812_vm7 = vcmask 57344   ;;  %s815_s15 = scalar_lea.sflag [#allocation6], %s1358_s26 }
  0x5c   : > { %946 = vmatprep.mubr.msk.f32.mxu0 %vm1159_vm1, %v1158_v1  ;;  %949 = vmatprep.subr.mxu1 %v1158_v1  ;;  %v916_v30 = vld [vmem:[%s1473_s6] ss:$0 sm:$0xff] }
  0x5d   : > { %945 = vmatpush3.msra.mxu0 %v565_v19  ;;  %v918_v34 = vld [vmem:[%s1474_s7] ss:$0 sm:$0xff]  ;;  %1016 = vset.pattern.permute.xlu1 %v1162_v38  ;;  %vm680_vm5 = vcmp.eq.s32.totalorder %v677_v52, %v679_v53  ;;  %vm683_vm6 = vcmp.le.s32.totalorder %v679_v53, %v677_v52 }
  0x5e   : > { %1017 = vset.pattern.permute.xlu0 %v1162_v38  ;;  %v920_v54 = vsel %vm680_vm5, 1.0, %v1158_v1  ;;  %v921_v63 = vsel %vm683_vm6, 1.0, %v1158_v1 }
 0x12e   : > { %v439_v4 = vpop.f32.mrb[0].mxu0 }
 0x12f   : > { %443 = vst.msk [vmem:[#allocation2 + $0x8] sm:$0xff] %vm362_vm0, %v439_v4  ;;  %v938_v5 = vpop.f32.mrb[1].mxu0 }
 0x136   : > { %v446_v7 = vld [vmem:[#allocation2 + $0x8] sm:$0xff] }
 0x137   : > { %448 = vrot.lane.b32.xlu0 %v446_v7, %s1160_s20  ;;  %v452_v8 = vld [vmem:[#allocation2 + $0xa] sm:$0xff] }
 0x138   : > { %v444_v10 = vld [vmem:[#allocation2 + $0x6] sm:$0xff] }
 0x13b   : > { %454 = vrot.lane.b32.xlu0 %v452_v8, %s1161_s25 }
 0x1a9   : > { %v449_v9 = vpop.permute.xlu0 %448 }
 0x1aa   : > { %v451_v11 = vadd.f32 %v449_v9, %v444_v10 }
 0x1ad   : > { %v455_v13 = vpop.permute.xlu0 %454 }
 0x1ae   : > { %v457_v14 = vadd.f32 %v455_v13, %v451_v11 }
 0x1b0   : > { %v465_v15 = vadd.f32 %v913_v12, %v457_v14 }
 0x1b2   : > { %v466_v16 = vmax.f32 %v465_v15, 0.0 }
 0x1b4   : > { %942 = vmatmul.mubr.msk.f32.vlgmr.msra.gmra.mrb[0].mxu1 %vm369_vm2, %v466_v16 }
 0x1b5   : > { %951 = vmatprep.mubr.msk.f32.mxu1 %vm1159_vm1, %v1158_v1 }
 0x287   : > { %v537_v17 = vpop.f32.mrb[0].mxu1 }
 0x288   : > { %541 = vst.msk [vmem:[#allocation2 + $0x8] sm:$0xff] %vm362_vm0, %v537_v17  ;;  %v943_v18 = vpop.f32.mrb[1].mxu1 }
 0x28f   : > { %v544_v20 = vld [vmem:[#allocation2 + $0x8] sm:$0xff] }
 0x290   : > { %546 = vrot.lane.b32.xlu1 %v544_v20, %s1160_s20  ;;  %v550_v21 = vld [vmem:[#allocation2 + $0xa] sm:$0xff]  ;;  %s923_s20 = sshll.u32 %s1238_s8, 4  ;;  %s1163_s8 = smov [#allocation9]  }
 0x291   : > { %v542_v23 = vld [vmem:[#allocation2 + $0x6] sm:$0xff]  ;;  %s1423_s29 = scalar_lea.hbm %s1476_s9, %s923_s20  ;;  %s1088_s24 = sshll.u32 %s1163_s8, 4  ;;  %s1089_s24 = int_to_ptr.vmem [resolvable:$false] %s1088_s24 }
 0x292   : > { %s1090_s28 = scalar_lea.vmem %s1089_s24, 32 }
 0x294   : > { %552 = vrot.lane.b32.xlu1 %v550_v21, %s1161_s25  ;;  %s361_s25 = scalar_lea.vmem [#allocation9], %s1358_s26 }
 0x295   : > { %s827_s19 = sshll.u32 %s361_s25, 4  ;;  %s1425_s19 = int_to_ptr.vmem [resolvable:$true] %s827_s19 }
 0x296   : > { %s1084_s10 = scalar_lea.vmem %s1425_s19, 16  ;;  %p1091_p13 = scmp.lt.s32.totalorder %s1425_s19, %s1089_s24 }
 0x297   : > { %p1085_p6 = scmp.ne.s32.totalorder %s1425_s19, %s1084_s10  ;;  %p1092_p0 = scmp.lt.s32.totalorder %s1090_s28, %s1084_s10 }
 0x299   : > { %p1086_p9 = pnand %p1085_p6, %p1309_p8  ;;  %p1093_p5 = por %p1092_p0, %p1091_p13 }
 0x29b   : > { %p1087_p12 = pneg %p1086_p9 }
 0x29d   : > { %p1094_p10 = pnand %p1093_p5, %p1087_p12 }
 0x302   : > { %v547_v22 = vpop.permute.xlu1 %546 }
 0x303   : > { %v549_v24 = vadd.f32 %v547_v22, %v542_v23 }
 0x306   : > { %v553_v26 = vpop.permute.xlu1 %552 }
 0x307   : > { %v555_v27 = vadd.f32 %v553_v26, %v549_v24 }
 0x309   : > { %v563_v28 = vadd.f32 %v915_v25, %v555_v27 }
 0x30b   : > { %v564_v29 = vmax.f32 %v563_v28, 0.0 }
 0x30d   : > { %947 = vmatmul.mubr.msk.f32.vlgmr.msra.gmra.mrb[2].mxu0 %vm369_vm2, %v564_v29  ;;  %950 = vmatpush3.msra.mxu1 %v564_v29 }
 0x3e0   : > { %v642_v31 = vpop.f32.mrb[2].mxu0 }
 0x3e1   : > { %v643_v32 = vadd.f32 %v916_v30, %v642_v31  ;;  %v948_v33 = vpop.f32.mrb[3].mxu0 }
 0x3e3   : > { %v646_v35 = vmax.f32 %v643_v32, 0.0 }
 0x3e5   : > { %v654_v36 = vmul.f32 %v918_v34, %v646_v35 }
 0x3e7   : > { %v656_v37 = vsel %vm655_vm4, %v654_v36, 0.0 }
 0x3e8   : > { %657 = vadd.xlane.f32.xlu0 %v656_v37 }
 0x475   : > { %v658_v40 = vpop.xlane.xlu0 %657 }
 0x476   : > { %v666_v41 = vadd.f32 %v919_v39, %v658_v40 }
 0x478   : > { %v668_v42 = vand.u32 2147483647, %v666_v41  ;;  %v667_v48 = vmax.f32 %v666_v41, 0.0 }
 0x47a   : > { %v669_v43 = vsub.f32 0.0, %v668_v42 }
 0x47c   : > { %v670_v44 = vmul.f32 1.442695, %v669_v43 }
 0x47e   : > { %1018 = vpow2.f32 %v670_v44 }
 0x488   : > { %v1019_v45 = vpop.eup %1018 }
 0x489   : > { %v672_v46 = vadd.f32 1.0, %v1019_v45 }
 0x48b   : > { %1020 = vlog2.f32 %v672_v46 }
 0x495   : > { %v1021_v47 = vpop.eup %1020 }
 0x496   : > { %v674_v49 = vmul.f32 0.6931472, %v1021_v47 }
 0x498   : > { %v675_v50 = vadd.f32 %v674_v49, %v667_v48 }
 0x49a   : > { %688 = vperm.xlu1 %1016, %v675_v50   ;;  %v703_v4 = vmul.f32 0.5, %v675_v50 }
 0x519   : > { %v689_v55 = vpop.permute.xlu1 %688 }
 0x51a   : > { %v691_v56 = vmul.f32 %v920_v54, %v689_v55 }
 0x51c   : > { %v692_v57 = vsel %vm369_vm2, %v691_v56, 0.0 }
 0x51d   : > { %v693_v58 = vrot.slane %v692_v57, 4 }
 0x51f   : > { %v694_v59 = vadd.f32 %v693_v58, %v692_v57 }
 0x521   : > { %v695_v60 = vrot.slane %v694_v59, 2 }
 0x523   : > { %v696_v61 = vadd.f32 %v695_v60, %v694_v59 }
 0x525   : > { %v697_v62 = vrot.slane %v696_v61, 1 }
 0x527   : > { %v698_v0 = vadd.f32 %v697_v62, %v696_v61 }
 0x529   : > { %v699_v2 = vmul.f32 %v921_v63, %v698_v0 }
 0x52b   : > { %v700_v3 = vsel %vm369_vm2, %v699_v2, 0.0 }
 0x52c   : > { %701 = vadd.xlane.f32.xlu1 %v700_v3 }
 0x5b9   : > { %v702_v5 = vpop.xlane.xlu1 %701 }
 0x5ba   : > { %v704_v6 = vsub.f32 %v702_v5, %v703_v4 }
 0x5bc   : > { %707 = vperm.xlu0 %1017, %v704_v6  }
 0x63b   : > { %v708_v7 = vpop.permute.xlu0 %707 }
 0x63c   : > { %v710_v8 = vsub.f32 %v708_v7, %v698_v0 }
 0x63e   : > { %v711_v9 = vmul.f32 -0.01, %v710_v8 }
 0x640   : > { %v712_v10 = vmul.f32 %v711_v9, %v710_v8 }
 0x642   : > { %v713_v11 = vsel %vm369_vm2, %v712_v10, -inf }
 0x643   : > { %v714_v12 = vrot.slane %v713_v11, 4 }
 0x645   : > { %v715_v13 = vmax.f32 %v713_v11, %v714_v12 }
 0x647   : > { %v716_v14 = vrot.slane %v715_v13, 2 }
 0x649   : > { %v717_v15 = vmax.f32 %v715_v13, %v716_v14 }
 0x64b   : > { %v718_v1 = vrot.slane %v717_v15, 1 }
 0x64d   : > { %v719_v16 = vmax.f32 %v717_v15, %v718_v1 }
 0x64f   : > { %v720_v17 = vsub.f32 %v712_v10, %v719_v16 }
 0x651   : > { %v721_v18 = vmul.f32 1.442695, %v720_v17 }
 0x653   : > { %1022 = vpow2.f32 %v721_v18 }
 0x65d   : > { %v1023_v19 = vpop.eup %1022 }
 0x65e   : > { %v723_v20 = vsel %vm369_vm2, %v1023_v19, 0.0 }
 0x65f   : > { %v724_v21 = vrot.slane %v723_v20, 4 }
 0x661   : > { %v725_v22 = vadd.f32 %v724_v21, %v723_v20 }
 0x663   : > { %v726_v23 = vrot.slane %v725_v22, 2 }
 0x665   : > { %v727_v24 = vadd.f32 %v726_v23, %v725_v22 }
 0x667   : > { %v728_v25 = vrot.slane %v727_v24, 1 }
 0x669   : > { %v729_v26 = vadd.f32 %v728_v25, %v727_v24 }
 0x66b   : > { %1024 = vrcp.f32 %v729_v26 }
 0x675   : > { %v1025_v27 = vpop.eup %1024 }
 0x676   : > { %v731_v28 = vmul.f32 %v1025_v27, %v1023_v19 }
 0x678   : > { %952 = vmatmul.mubr.msk.f32.vlgmr.msra.gmra.mrb[2].mxu1 %vm369_vm2, %v731_v28 }
 0x74b   : > { %v801_v29 = vpop.f32.mrb[2].mxu1 }
 0x74c   : > { %v805_v30 = vsel %vm369_vm2, %v801_v29, 0.0  ;;  %v953_v31 = vpop.f32.mrb[3].mxu1 }
 0x74d   : > { %v806_v32 = vrot.slane %v805_v30, 4 }
 0x74f   : > { %v807_v33 = vadd.f32 %v806_v32, %v805_v30 }
 0x751   : > { %v808_v34 = vrot.slane %v807_v33, 2 }
 0x753   : > { %v809_v35 = vadd.f32 %v808_v34, %v807_v33 }
 0x755   : > { %v810_v36 = vrot.slane %v809_v35, 1 }
 0x757   : > { %v811_v37 = vadd.f32 %v810_v36, %v809_v35 }
 0x759   : > { %813 = vst.msk [vmem:[%s361_s25] sm:$0x1] %vm812_vm7, %v811_v37 }
 0x75a   : > { %1097 = shalt.err (!%p1094_p10)
}
 0x75b   : > { %s1098_s26 = scalar_lea.hbm %s1423_s29, 16  ;;  %s1102_s20 = scalar_lea.hbm %s1476_s9, 32 }
 0x75c   : > { %p1099_p1 = scmp.ne.s32.totalorder %s1423_s29, %s1098_s26  ;;  %p1103_p3 = scmp.lt.u32.totalorder %s1423_s29, %s1476_s9 }
 0x75d   : > { %p1104_p4 = scmp.lt.u32.totalorder %s1102_s20, %s1098_s26  ;;  %p1106_p6 = scmp.lt.u32.totalorder %s1098_s26, %s1423_s29 }
 0x75e   : > { %p1100_p2 = pnand %p1099_p1, %p1309_p8 }
 0x75f   : > { %p1105_p11 = por %p1104_p4, %p1103_p3 }
 0x760   : > { %p1101_p7 = pneg %p1100_p2 }
 0x761   : > { %p1107_p9 = por %p1106_p6, %p1105_p11 }
 0x763   : > { %p1108_p12 = pnand %p1107_p9, %p1101_p7 }
 0x765   : > { %1111 = shalt.err (!%p1108_p12)
}
 0x766   : > { %960 = dma.vmem_to_hbm [thread:$0]  (%p1309_p8), %s1425_s19, 16, %s1423_s29, %s815_s15  }
 0x767 PF: > { %s839_s30 = sand.u32 1, %s1142_s11   ;;  %p1495_p13 = scmp.ne.s32.totalorder %s1481_s17, 0 }
 0x768   : > { %p1496_p0 = scmp.ge.s32.totalorder %s1154_s14, 2  ;;  %s840_s10 = scalar_lea.sflag [#allocation6], %s839_s30 }
 0x76a   : > { %p971_p5 = pnand %p1496_p0, %p1495_p13 }
 0x76c   : > { %1137 = dma.done.wait (!%p971_p5), %s840_s10, 16  }
 0x76d   : > { %1139 = vsyncadd (!%p971_p5), %s840_s10, 4294967280  ;;  %p25_p10 = scmp.ge.s32.totalorder %s1265_s21, 4   ;;  %s1497_s11 = smov %s1146_s12 }
 0x76e   : > { %s1498_s12 = smov %s1150_s13  ;;  %s1499_s13 = smov %s1301_s27 }
 0x76f   : > { %s1500_s14 = smov %s1265_s21  ;;  %27 = sbr.rel (!%p25_p10) target bundleno = 9 (0x9), region = 105 }
 0x776   :  { %844 = vsyncpa [#allocation5], 1 }
 0x777   :  { %846 = vsyncpa [#allocation5 + $0x1], 1 }
 0x778   :  { %847 = vsyncpa [#allocation8], 1 }
 0x779   :  { %848 = vsyncpa [#allocation6], 1 }
 0x77a   :  { %850 = vsyncpa [#allocation6 + $0x1], 1 }

</bundles_post_ra>
